<compile_context>
chip_gen: v5e
topology: v5e:2x2
jax: 0.10.0
libtpu: 0.0.40
codegen_flags: <defaults>
</compile_context>

<pallas_src>
import functools

import jax
import jax.numpy as jnp
from jax.experimental import pallas as pl
from jax.experimental.pallas import tpu as pltpu


def _round_up(x, m):
    return ((x + m - 1) // m) * m


# ----------------------------------------------------------------------------
# Pallas kernel: fused  (X @ W_scaled) + bias  [+ residual]  [+ ReLU]
# with a K-tiled reduction grid axis and an f32 VMEM accumulator.
# ----------------------------------------------------------------------------
def _fused_matmul_bias_kernel(*refs, relu, has_res):
    if has_res:
        x_ref, w_ref, bias_ref, res_ref, o_ref, acc_ref = refs
    else:
        x_ref, w_ref, bias_ref, o_ref, acc_ref = refs
        res_ref = None

    k = pl.program_id(2)

    @pl.when(k == 0)
    def _():
        acc_ref[...] = jnp.zeros_like(acc_ref)

    # bf16 x bf16 -> f32 accumulate on the MXU.
    acc_ref[...] += jnp.dot(x_ref[...], w_ref[...],
                            preferred_element_type=jnp.float32)

    @pl.when(k == pl.num_programs(2) - 1)
    def _():
        out = acc_ref[...] + bias_ref[...]
        if has_res:
            out = out + res_ref[...].astype(jnp.float32)
        if relu:
            out = jnp.maximum(out, 0.0)
        o_ref[...] = out.astype(o_ref.dtype)


def fused_matmul_bn(x, w_scaled, bias, residual=None, relu=True,
                    out_dtype=jnp.bfloat16, tm=256, tn=256, tk=512):
    """out[m,n] = act( sum_k x[m,k] w_scaled[k,n] + bias[n] (+ res[m,n]) ).

    x / w_scaled / residual are bf16 (MXU operands); accumulation is f32 in
    VMEM scratch; bias stays f32 for the epilogue.
    """
    M, K = x.shape
    Kw, N = w_scaled.shape
    assert K == Kw

    # Lane-dense, MXU-friendly padded sizes (multiples of 128), then round up
    # to the chosen tile sizes (no single-block fallback; we pad instead).
    Mp, Kp, Np = _round_up(M, 128), _round_up(K, 128), _round_up(N, 128)
    tm, tn, tk = min(tm, Mp), min(tn, Np), min(tk, Kp)
    Mp, Kp, Np = _round_up(Mp, tm), _round_up(Kp, tk), _round_up(Np, tn)

    xp = jnp.zeros((Mp, Kp), x.dtype).at[:M, :K].set(x)
    wp = jnp.zeros((Kp, Np), w_scaled.dtype).at[:K, :N].set(w_scaled)
    bp = jnp.zeros((1, Np), jnp.float32).at[0, :N].set(bias.astype(jnp.float32))

    args = [xp, wp, bp]
    in_specs = [
        pl.BlockSpec((tm, tk), lambda i, j, k: (i, k)),
        pl.BlockSpec((tk, tn), lambda i, j, k: (k, j)),
        pl.BlockSpec((1, tn), lambda i, j, k: (0, j)),
    ]
    has_res = residual is not None
    if has_res:
        rp = jnp.zeros((Mp, Np), residual.dtype).at[:M, :N].set(residual)
        args.append(rp)
        in_specs.append(pl.BlockSpec((tm, tn), lambda i, j, k: (i, j)))

    kernel = functools.partial(_fused_matmul_bias_kernel,
                               relu=relu, has_res=has_res)
    out = pl.pallas_call(
        kernel,
        out_shape=jax.ShapeDtypeStruct((Mp, Np), out_dtype),
        grid=(Mp // tm, Np // tn, Kp // tk),  # reduction axis last
        in_specs=in_specs,
        out_specs=pl.BlockSpec((tm, tn), lambda i, j, k: (i, j)),
        scratch_shapes=[pltpu.VMEM((tm, tn), jnp.float32)],
        compiler_params=pltpu.CompilerParams(
            dimension_semantics=("parallel", "parallel", "arbitrary"),
            vmem_limit_bytes=48 * 1024 * 1024),
    )(*args)
    return out[:M, :N]


# ----------------------------------------------------------------------------
# Host-side glue: im2col (bf16), BN folding, weight prep
# ----------------------------------------------------------------------------
def im2col_3x3(x_nhwc, stride):
    """3x3 conv, padding=1, given stride. Returns (N*Ho*Wo, 9*C), Ho, Wo."""
    N, H, W, C = x_nhwc.shape
    xp = jnp.pad(x_nhwc, ((0, 0), (1, 1), (1, 1), (0, 0)))
    Ho = (H + 2 - 3) // stride + 1
    Wo = (W + 2 - 3) // stride + 1
    cols = []
    for dh in range(3):
        for dw in range(3):
            patch = xp[:, dh:dh + stride * (Ho - 1) + 1:stride,
                       dw:dw + stride * (Wo - 1) + 1:stride, :]
            cols.append(patch)
    patches = jnp.concatenate(cols, axis=-1)  # (N, Ho, Wo, 9*C), tap-major
    return patches.reshape(N * Ho * Wo, 9 * C), Ho, Wo


def fold_bn(gamma, beta, mean, var, eps=1e-5):
    scale = gamma / jnp.sqrt(var + eps)
    bias = beta - mean * scale
    return scale, bias


def scaled_conv3x3_weight(w_oihw, scale):
    # (Cout, Cin, 3, 3) -> (9*Cin, Cout) tap-major, with BN scale folded into
    # the columns so the kernel epilogue is just "+ bias".  Cast to bf16.
    cout = w_oihw.shape[0]
    w = jnp.transpose(w_oihw, (2, 3, 1, 0)).reshape(-1, cout)
    return (w * scale[None, :]).astype(jnp.bfloat16)


def make_params(key, cin, cout, stride):
    ks = jax.random.split(key, 16)
    p = {
        "w1": jax.random.normal(ks[0], (cout, cin, 3, 3), jnp.float32) * 0.1,
        "w2": jax.random.normal(ks[1], (cout, cout, 3, 3), jnp.float32) * 0.1,
        "bn1": (jax.random.uniform(ks[2], (cout,), minval=0.5, maxval=1.5),
                jax.random.normal(ks[3], (cout,)) * 0.1,
                jax.random.normal(ks[4], (cout,)) * 0.1,
                jax.random.uniform(ks[5], (cout,), minval=0.5, maxval=1.5)),
        "bn2": (jax.random.uniform(ks[6], (cout,), minval=0.5, maxval=1.5),
                jax.random.normal(ks[7], (cout,)) * 0.1,
                jax.random.normal(ks[8], (cout,)) * 0.1,
                jax.random.uniform(ks[9], (cout,), minval=0.5, maxval=1.5)),
    }
    if stride != 1 or cin != cout:
        p["w_sc"] = jax.random.normal(ks[10], (cout, cin, 1, 1), jnp.float32) * 0.1
        p["bn_sc"] = (jax.random.uniform(ks[11], (cout,), minval=0.5, maxval=1.5),
                      jax.random.normal(ks[12], (cout,)) * 0.1,
                      jax.random.normal(ks[13], (cout,)) * 0.1,
                      jax.random.uniform(ks[14], (cout,), minval=0.5, maxval=1.5))
    return p


def basic_block1_pallas(x_nchw, params, stride):
    """Forward pass of BasicBlock1 using Pallas kernels. Returns NCHW f32."""
    x = jnp.transpose(x_nchw, (0, 2, 3, 1)).astype(jnp.bfloat16)  # NHWC, bf16
    N, H, W, cin = x.shape
    cout = params["w1"].shape[0]

    # conv1 + bn1 + relu   (bf16 intermediate -> halves HBM writeback/re-read)
    p1, Ho, Wo = im2col_3x3(x, stride)
    s1, b1 = fold_bn(*params["bn1"])
    out1 = fused_matmul_bn(p1, scaled_conv3x3_weight(params["w1"], s1), b1,
                           residual=None, relu=True, out_dtype=jnp.bfloat16)
    out1_nhwc = out1.reshape(N, Ho, Wo, cout)

    # shortcut
    if stride != 1 or cin != cout:
        xs = x[:, ::stride, ::stride, :].reshape(N * Ho * Wo, cin)
        ssc, bsc = fold_bn(*params["bn_sc"])
        wsc = (params["w_sc"][:, :, 0, 0].T * ssc[None, :]).astype(jnp.bfloat16)
        shortcut = fused_matmul_bn(xs, wsc, bsc, residual=None, relu=False,
                                   out_dtype=jnp.bfloat16)
    else:
        shortcut = x.reshape(N * Ho * Wo, cout)

    # conv2 + bn2 + residual add + relu (fully fused, f32 final output)
    p2, _, _ = im2col_3x3(out1_nhwc, 1)
    s2, b2 = fold_bn(*params["bn2"])
    out2 = fused_matmul_bn(p2, scaled_conv3x3_weight(params["w2"], s2), b2,
                           residual=shortcut, relu=True, out_dtype=jnp.float32)

    out_nhwc = out2.reshape(N, Ho, Wo, cout)
    return jnp.transpose(out_nhwc, (0, 3, 1, 2))  # back to NCHW


# ----------------------------------------------------------------------------
# Pure-JAX reference (exact PyTorch semantics: explicit padding=1, eval BN)
# ----------------------------------------------------------------------------
def _conv_ref(x_nhwc, w_oihw, stride, padding):
    return jax.lax.conv_general_dilated(
        x_nhwc, jnp.transpose(w_oihw, (2, 3, 1, 0)),
        window_strides=(stride, stride), padding=padding,
        dimension_numbers=("NHWC", "HWIO", "NHWC"))


def basic_block1_ref(x_nchw, params, stride):
    x = jnp.transpose(x_nchw, (0, 2, 3, 1))
    cin = x.shape[-1]
    cout = params["w1"].shape[0]
    s1, b1 = fold_bn(*params["bn1"])
    out = jax.nn.relu(
        _conv_ref(x, params["w1"], stride, ((1, 1), (1, 1))) * s1 + b1)
    s2, b2 = fold_bn(*params["bn2"])
    out = _conv_ref(out, params["w2"], 1, ((1, 1), (1, 1))) * s2 + b2
    if stride != 1 or cin != cout:
        ssc, bsc = fold_bn(*params["bn_sc"])
        sc = _conv_ref(x, params["w_sc"], stride, ((0, 0), (0, 0))) * ssc + bsc
    else:
        sc = x
    out = jax.nn.relu(out + sc)
    return jnp.transpose(out, (0, 3, 1, 2))


if __name__ == "__main__":
    key = jax.random.PRNGKey(0)

    # Case 1: projection shortcut (stride=2, Cin != Cout).
    N, Cin, Cout, H, W, stride = 2, 4, 8, 16, 16, 2
    kx, kp, key = jax.random.split(key, 3)
    x = jax.random.normal(kx, (N, Cin, H, W), jnp.float32)
    params = make_params(kp, Cin, Cout, stride)

    out = jax.block_until_ready(basic_block1_pallas(x, params, stride))
    ref = basic_block1_ref(x, params, stride)
    assert out.shape == ref.shape == (N, Cout, H // stride, W // stride)
    assert jnp.allclose(out, ref, atol=5e-2, rtol=5e-2), (
        float(jnp.max(jnp.abs(out - ref))))

    # Case 2: identity shortcut (stride=1, Cin == Cout).
    kx2, kp2 = jax.random.split(key)
    x2 = jax.random.normal(kx2, (2, 8, 8, 8), jnp.float32)
    params2 = make_params(kp2, 8, 8, 1)
    out2 = jax.block_until_ready(basic_block1_pallas(x2, params2, 1))
    ref2 = basic_block1_ref(x2, params2, 1)
    assert out2.shape == ref2.shape == (2, 8, 8, 8)
    assert jnp.allclose(out2, ref2, atol=5e-2, rtol=5e-2), (
        float(jnp.max(jnp.abs(out2 - ref2))))

    print("KERNEL_OK")
</pallas_src>

<mosaic_0001>
module attributes {stable_mosaic.version = 11 : i64} {
  func.func @_fused_matmul_bias_kernel(%arg0: i32, %arg1: i32, %arg2: i32, %arg3: memref<128x128xbf16, #tpu.memory_space<vmem>>, %arg4: memref<128x128xbf16, #tpu.memory_space<vmem>>, %arg5: memref<1x128xf32, #tpu.memory_space<vmem>>, %arg6: memref<128x128xbf16, #tpu.memory_space<vmem>>, %arg7: memref<128x128xf32, #tpu.memory_space<vmem>>) attributes {dimension_semantics = [#tpu.dimension_semantics<parallel>, #tpu.dimension_semantics<parallel>, #tpu.dimension_semantics<arbitrary>], iteration_bounds = array<i64: 1, 1, 1>, scalar_prefetch = 0 : i64, scratch_operands = 1 : i64, tpu.core_type = #tpu.core_type<tc>, window_params = [{transform_indices = @transform_0, window_bounds = array<i64: 128, 128>}, {transform_indices = @transform_1, window_bounds = array<i64: 128, 128>}, {transform_indices = @transform_2, window_bounds = array<i64: 1, 128>}, {transform_indices = @transform_3, window_bounds = array<i64: 128, 128>}]} {
    %c0_i32 = arith.constant 0 : i32
    %0 = arith.cmpi eq, %arg2, %c0_i32 : i32
    %1 = arith.extui %0 : i1 to i32
    %c0_i32_0 = arith.constant 0 : i32
    %2 = arith.cmpi ne, %1, %c0_i32_0 : i32
    scf.if %2 {
      %cst_10 = arith.constant 0.000000e+00 : f32
      %12 = vector.broadcast %cst_10 : f32 to vector<128x128xf32>
      %c0_11 = arith.constant 0 : index
      %c0_12 = arith.constant 0 : index
      %13 = vector.load %arg7[%c0_11, %c0_12] : memref<128x128xf32, #tpu.memory_space<vmem>>, vector<128x128xf32>
      tpu.vector_store %arg7[%c0_11, %c0_12], %12 {strides = array<i32>} : memref<128x128xf32, #tpu.memory_space<vmem>>, vector<128x128xf32>,
    } else {
    }
    %c0 = arith.constant 0 : index
    %c0_1 = arith.constant 0 : index
    %3 = vector.load %arg7[%c0, %c0_1] : memref<128x128xf32, #tpu.memory_space<vmem>>, vector<128x128xf32>
    %c0_2 = arith.constant 0 : index
    %c0_3 = arith.constant 0 : index
    %4 = vector.load %arg3[%c0_2, %c0_3] : memref<128x128xbf16, #tpu.memory_space<vmem>>, vector<128x128xbf16>
    %c0_4 = arith.constant 0 : index
    %c0_5 = arith.constant 0 : index
    %5 = vector.load %arg4[%c0_4, %c0_5] : memref<128x128xbf16, #tpu.memory_space<vmem>>, vector<128x128xbf16>
    %cst = arith.constant dense<0.000000e+00> : vector<128x128xf32>
    %6 = tpu.matmul %4, %5, %cst {dimension_numbers = #tpu.dot_dimension_numbers<[1], [0], [0], [1], [0, 0, 1, 1], [], []>} : vector<128x128xbf16>, vector<128x128xbf16>, vector<128x128xf32> -> vector<128x128xf32>
    %7 = arith.addf %3, %6 : vector<128x128xf32>
    %c0_6 = arith.constant 0 : index
    %c0_7 = arith.constant 0 : index
    %8 = vector.load %arg7[%c0_6, %c0_7] : memref<128x128xf32, #tpu.memory_space<vmem>>, vector<128x128xf32>
    tpu.vector_store %arg7[%c0_6, %c0_7], %7 {strides = array<i32>} : memref<128x128xf32, #tpu.memory_space<vmem>>, vector<128x128xf32>,
    %c0_i32_8 = arith.constant 0 : i32
    %9 = arith.cmpi eq, %arg2, %c0_i32_8 : i32
    %10 = arith.extui %9 : i1 to i32
    %c0_i32_9 = arith.constant 0 : i32
    %11 = arith.cmpi ne, %10, %c0_i32_9 : i32
    scf.if %11 {
      %c0_10 = arith.constant 0 : index
      %c0_11 = arith.constant 0 : index
      %12 = vector.load %arg7[%c0_10, %c0_11] : memref<128x128xf32, #tpu.memory_space<vmem>>, vector<128x128xf32>
      %c0_12 = arith.constant 0 : index
      %c0_13 = arith.constant 0 : index
      %13 = vector.load %arg5[%c0_12, %c0_13] : memref<1x128xf32, #tpu.memory_space<vmem>>, vector<1x128xf32>
      %14 = vector.broadcast %13 : vector<1x128xf32> to vector<128x128xf32>
      %15 = arith.addf %12, %14 : vector<128x128xf32>
      %cst_14 = arith.constant 0.000000e+00 : f32
      %16 = vector.broadcast %cst_14 : f32 to vector<128x128xf32>
      %17 = arith.maximumf %15, %16 : vector<128x128xf32>
      %18 = arith.truncf %17 : vector<128x128xf32> to vector<128x128xbf16>
      %c0_15 = arith.constant 0 : index
      %c0_16 = arith.constant 0 : index
      %19 = vector.load %arg6[%c0_15, %c0_16] : memref<128x128xbf16, #tpu.memory_space<vmem>>, vector<128x128xbf16>
      tpu.vector_store %arg6[%c0_15, %c0_16], %18 {strides = array<i32>} : memref<128x128xbf16, #tpu.memory_space<vmem>>, vector<128x128xbf16>,
    } else {
    }
    return
  }
  func.func @transform_0(%arg0: i32, %arg1: i32, %arg2: i32) -> (i32, i32) {
    %c0_i32 = arith.constant 0 : i32
    return %arg0, %arg2 : i32, i32
  }
  func.func @transform_1(%arg0: i32, %arg1: i32, %arg2: i32) -> (i32, i32) {
    %c0_i32 = arith.constant 0 : i32
    return %arg2, %arg1 : i32, i32
  }
  func.func @transform_2(%arg0: i32, %arg1: i32, %arg2: i32) -> (i32, i32) {
    %c0_i32 = arith.constant 0 : i32
    %c0_i32_0 = arith.constant 0 : i32
    return %c0_i32, %arg1 : i32, i32
  }
  func.func @transform_3(%arg0: i32, %arg1: i32, %arg2: i32) -> (i32, i32) {
    %c0_i32 = arith.constant 0 : i32
    return %arg0, %arg1 : i32, i32
  }
}

</mosaic_0001>

<bundles_post_ra>
// kernel: tpu_custom_call.1
= control target key start
LH: loop header
LB: loop body
LE: loop exit
PB: predicated region body
PF: predicated region fallthrough
CT: control target
= control target key end

     0   :  { %8 = vsyncpa [#allocation4], 0  ;;  %s680_s0 = inlined_call_operand.hbm [shape: bf16[128,128], index: 0, kind: input, shape index: {}]   ;;  %s681_s1 = inlined_call_operand.hbm [shape: bf16[128,128], index: 1, kind: input, shape index: {}]   ;;  %s682_s2 = inlined_call_operand.vmem [shape: f32[1,128], index: 2, kind: input, shape index: {}]   ;;  %s683_s3 = inlined_call_operand.hbm [shape: bf16[128,128], index: 3, kind: output, shape index: {}]  }
   0x1   :  { %9 = vsyncpa [#allocation7], 0 }
   0x2   :  { %10 = vsyncpa [#allocation5], 0  ;;  %s15_s14 = sshll.u32 %s680_s0, 4  ;;  %s634_s15 = smov [#allocation3]   ;;  %s16_s14 = int_to_ptr.hbm [resolvable:$true] %s15_s14 }
   0x3   :  { %s17_s16 = sshll.u32 %s634_s15, 4  ;;  %s28_s19 = sshll.u32 %s681_s1, 4  ;;  %s18_s16 = int_to_ptr.vmem [resolvable:$true] %s17_s16  ;;  %s29_s19 = int_to_ptr.hbm [resolvable:$true] %s28_s19 }
   0x4   :  { %s635_s20 = smov 64   ;;  %s636_s21 = smov 4  }
   0x5   :  { %23 = dma.hbm_to_vmem [thread:$0]  %s16_s14, 1024, %s18_s16, [#allocation4], %s635_s20, %s635_s20, %s636_s21  }
   0x6   :  { %s637_s22 = smov [#allocation6]  }
   0x7   :  { %s30_s23 = sshll.u32 %s637_s22, 4  ;;  %s31_s23 = int_to_ptr.vmem [resolvable:$true] %s30_s23 }
   0x8   :  { %36 = dma.hbm_to_vmem [thread:$0]  %s29_s19, 1024, %s31_s23, [#allocation7], %s635_s20, %s635_s20, %s636_s21  }
   0x9   :  { %628 = dma.done.wait [#allocation4], 1024  }
   0xa   :  { %629 = vsyncadd [#allocation4], 4294966272 }
   0xb   :  { %630 = dma.done.wait [#allocation7], 1024  }
   0xc   :  { %631 = vsyncadd [#allocation7], 4294966272  ;;  %v478_v0 = vld [vmem:[#allocation6 + $0x38] sm:$0xff]  ;;  %v477_v1 = vld [vmem:[#allocation6 + $0x30] sm:$0xff]  ;;  %s385_s27 = sshll.u32 %s683_s3, 4  ;;  %s386_s27 = int_to_ptr.hbm [resolvable:$true] %s385_s27 }
   0xd   :  { %211 = vmatpush.bf16.msra.mxu0 %v478_v0  ;;  %526 = vmatpush.bf16.msra.mxu1 %v478_v0  ;;  %v476_v2 = vld [vmem:[#allocation6 + $0x28] sm:$0xff]  ;;  %v475_v3 = vld [vmem:[#allocation6 + $0x20] sm:$0xff]  ;;  %v474_v4 = vld [vmem:[#allocation6 + $0x18] sm:$0xff] }
   0xe   :  { %527 = vmatpush.bf16.msra.mxu2 %v478_v0  ;;  %528 = vmatpush.bf16.msra.mxu3 %v478_v0  ;;  %v473_v5 = vld [vmem:[#allocation6 + $0x10] sm:$0xff]  ;;  %v472_v6 = vld [vmem:[#allocation6 + $0x8] sm:$0xff]  ;;  %v471_v7 = vld [vmem:[#allocation6] sm:$0xff] }
   0xf   :  { %v463_v8 = vld [vmem:[#allocation3] sm:$0xff]  ;;  %v465_v9 = vld [vmem:[#allocation3 + $0x10] sm:$0xff]  ;;  %v464_v12 = vld [vmem:[#allocation3 + $0x8] sm:$0xff] }
  0x10   :  { %v467_v10 = vld [vmem:[#allocation3 + $0x20] sm:$0xff]  ;;  %v469_v11 = vld [vmem:[#allocation3 + $0x30] sm:$0xff]  ;;  %v466_v13 = vld [vmem:[#allocation3 + $0x18] sm:$0xff] }
  0x11   :  { %212 = vmatpush.bf16.msra.mxu0 %v477_v1  ;;  %529 = vmatpush.bf16.msra.mxu1 %v477_v1  ;;  %v468_v14 = vld [vmem:[#allocation3 + $0x28] sm:$0xff]  ;;  %v470_v15 = vld [vmem:[#allocation3 + $0x38] sm:$0xff]  ;;  %v555_v18 = vld [vmem:[%s682_s2] ss:$0 sm:$0xff]  ;;  %s638_s2 = smov [#allocation8]  }
  0x12   :  { %530 = vmatpush.bf16.msra.mxu2 %v477_v1  ;;  %531 = vmatpush.bf16.msra.mxu3 %v477_v1  ;;  %s383_s24 = sshll.u32 %s638_s2, 4  ;;  %s384_s24 = int_to_ptr.vmem [resolvable:$true] %s383_s24 }
  0x15   :  { %213 = vmatpush.bf16.msra.mxu0 %v476_v2  ;;  %532 = vmatpush.bf16.msra.mxu1 %v476_v2 }
  0x16   :  { %533 = vmatpush.bf16.msra.mxu2 %v476_v2  ;;  %534 = vmatpush.bf16.msra.mxu3 %v476_v2 }
  0x19   :  { %214 = vmatpush.bf16.msra.mxu0 %v475_v3  ;;  %535 = vmatpush.bf16.msra.mxu1 %v475_v3 }
  0x1a   :  { %536 = vmatpush.bf16.msra.mxu2 %v475_v3  ;;  %537 = vmatpush.bf16.msra.mxu3 %v475_v3 }
  0x1d   :  { %215 = vmatpush.bf16.msra.mxu0 %v474_v4  ;;  %538 = vmatpush.bf16.msra.mxu1 %v474_v4 }
  0x1e   :  { %539 = vmatpush.bf16.msra.mxu2 %v474_v4  ;;  %540 = vmatpush.bf16.msra.mxu3 %v474_v4 }
  0x21   :  { %216 = vmatpush.bf16.msra.mxu0 %v473_v5  ;;  %541 = vmatpush.bf16.msra.mxu1 %v473_v5 }
  0x22   :  { %542 = vmatpush.bf16.msra.mxu2 %v473_v5  ;;  %543 = vmatpush.bf16.msra.mxu3 %v473_v5 }
  0x25   :  { %217 = vmatpush.bf16.msra.mxu0 %v472_v6  ;;  %544 = vmatpush.bf16.msra.mxu1 %v472_v6 }
  0x26   :  { %545 = vmatpush.bf16.msra.mxu2 %v472_v6  ;;  %546 = vmatpush.bf16.msra.mxu3 %v472_v6 }
  0x29   :  { %218 = vmatpush.bf16.msra.mxu0 %v471_v7  ;;  %547 = vmatpush.bf16.msra.mxu1 %v471_v7 }
  0x2a   :  { %548 = vmatpush.bf16.msra.mxu2 %v471_v7  ;;  %549 = vmatpush.bf16.msra.mxu3 %v471_v7 }
  0x2c   :  { %219 = vmatmul.bf16.vlgmr.msra.gmra.mxu0 %v463_v8  ;;  %229 = vmatmul.bf16.vlgmr.msra.gmra.mxu1 %v465_v9 }
  0x2d   :  { %239 = vmatmul.bf16.vlgmr.msra.gmra.mxu2 %v467_v10  ;;  %249 = vmatmul.bf16.vlgmr.msra.gmra.mxu3 %v469_v11 }
  0x3c   :  { %224 = vmatmul.bf16.gmra.mxu0 %v464_v12  ;;  %234 = vmatmul.bf16.gmra.mxu1 %v466_v13 }
  0x3d   :  { %244 = vmatmul.bf16.gmra.mxu2 %v468_v14  ;;  %254 = vmatmul.bf16.gmra.mxu3 %v470_v15 }
  0xa9   :  { %v220_v16 = vpop.f32.mrf.mxu0  ;;  %v230_v17 = vpop.f32.mrf.mxu1 }
  0xaa   :  { %v315_v19 = vadd.f32 %v555_v18, %v220_v16  ;;  %v319_v20 = vadd.f32 %v555_v18, %v230_v17 }
  0xac   :  { %v331_v27 = vmax.f32 %v315_v19, 0.0  ;;  %v335_v28 = vmax.f32 %v319_v20, 0.0 }
  0xb0   :  { %v240_v21 = vpop.f32.mrf.mxu2  ;;  %v250_v22 = vpop.f32.mrf.mxu3 }
  0xb1   :  { %v222_v23 = vpop.f32.mrf.mxu0  ;;  %v232_v24 = vpop.f32.mrf.mxu1  ;;  %v323_v33 = vadd.f32 %v555_v18, %v240_v21  ;;  %v327_v34 = vadd.f32 %v555_v18, %v250_v22 }
  0xb2   :  { %v316_v25 = vadd.f32 %v555_v18, %v222_v23  ;;  %v320_v26 = vadd.f32 %v555_v18, %v232_v24 }
  0xb3   :  { %v339_v41 = vmax.f32 %v323_v33, 0.0  ;;  %v343_v42 = vmax.f32 %v327_v34, 0.0 }
  0xb4   :  { %v332_v29 = vmax.f32 %v316_v25, 0.0  ;;  %v336_v30 = vmax.f32 %v320_v26, 0.0 }
  0xb6   :  { %v482_v31 = vpack.c.bf16 %v332_v29, %v331_v27  ;;  %v492_v32 = vpack.c.bf16 %v336_v30, %v335_v28 }
  0xb8   :  { %483 = vst [vmem:[#allocation8] sm:$0xff] %v482_v31   ;;  %v242_v35 = vpop.f32.mrf.mxu2  ;;  %v252_v36 = vpop.f32.mrf.mxu3 }
  0xb9   :  { %520 = vst [vmem:[#allocation8 + $0x10] sm:$0xff] %v492_v32   ;;  %v324_v37 = vadd.f32 %v555_v18, %v242_v35  ;;  %v328_v38 = vadd.f32 %v555_v18, %v252_v36  ;;  %v225_v39 = vpop.f32.mrf.mxu0  ;;  %v235_v40 = vpop.f32.mrf.mxu1 }
  0xba   :  { %v317_v47 = vadd.f32 %v555_v18, %v225_v39  ;;  %v321_v48 = vadd.f32 %v555_v18, %v235_v40 }
  0xbb   :  { %v340_v43 = vmax.f32 %v324_v37, 0.0  ;;  %v344_v44 = vmax.f32 %v328_v38, 0.0 }
  0xbc   :  { %v333_v55 = vmax.f32 %v317_v47, 0.0  ;;  %v337_v56 = vmax.f32 %v321_v48, 0.0 }
  0xbd   :  { %v502_v45 = vpack.c.bf16 %v340_v43, %v339_v41  ;;  %v512_v46 = vpack.c.bf16 %v344_v44, %v343_v42 }
  0xbf   :  { %522 = vst [vmem:[#allocation8 + $0x20] sm:$0xff] %v502_v45  }
  0xc0   :  { %524 = vst [vmem:[#allocation8 + $0x30] sm:$0xff] %v512_v46   ;;  %v245_v49 = vpop.f32.mrf.mxu2  ;;  %v255_v50 = vpop.f32.mrf.mxu3 }
  0xc1   :  { %v227_v51 = vpop.f32.mrf.mxu0  ;;  %v237_v52 = vpop.f32.mrf.mxu1  ;;  %v325_v61 = vadd.f32 %v555_v18, %v245_v49  ;;  %v329_v62 = vadd.f32 %v555_v18, %v255_v50 }
  0xc2   :  { %v318_v53 = vadd.f32 %v555_v18, %v227_v51  ;;  %v322_v54 = vadd.f32 %v555_v18, %v237_v52 }
  0xc3   :  { %v341_v3 = vmax.f32 %v325_v61, 0.0  ;;  %v345_v4 = vmax.f32 %v329_v62, 0.0 }
  0xc4   :  { %v334_v57 = vmax.f32 %v318_v53, 0.0  ;;  %v338_v58 = vmax.f32 %v322_v54, 0.0 }
  0xc6   :  { %v487_v59 = vpack.c.bf16 %v334_v57, %v333_v55  ;;  %v497_v60 = vpack.c.bf16 %v338_v58, %v337_v56 }
  0xc8   :  { %519 = vst [vmem:[#allocation8 + $0x8] sm:$0xff] %v487_v59   ;;  %v247_v63 = vpop.f32.mrf.mxu2  ;;  %v257_v0 = vpop.f32.mrf.mxu3 }
  0xc9   :  { %521 = vst [vmem:[#allocation8 + $0x18] sm:$0xff] %v497_v60   ;;  %v326_v1 = vadd.f32 %v555_v18, %v247_v63  ;;  %v330_v2 = vadd.f32 %v555_v18, %v257_v0 }
  0xcb   :  { %v342_v5 = vmax.f32 %v326_v1, 0.0  ;;  %v346_v6 = vmax.f32 %v330_v2, 0.0 }
  0xcd   :  { %v507_v7 = vpack.c.bf16 %v342_v5, %v341_v3  ;;  %v517_v8 = vpack.c.bf16 %v346_v6, %v345_v4 }
  0xcf   :  { %523 = vst [vmem:[#allocation8 + $0x28] sm:$0xff] %v507_v7  }
  0xd0   :  { %525 = vst [vmem:[#allocation8 + $0x38] sm:$0xff] %v517_v8  }
  0xd1   :  { %391 = dma.vmem_to_hbm [thread:$0]  %s384_s24, 1024, %s386_s27, [#allocation5], %s635_s20, %s635_s20, %s636_s21  }
  0xd2   :  { %632 = dma.done.wait [#allocation5], 1024  }
  0xd3   :  { %633 = vsyncadd [#allocation5], 4294966272 }
  0xd4   :  { %396 = vsyncpa [#allocation4], 1 }
  0xd5   :  { %397 = vsyncpa [#allocation7], 1 }
  0xd6   :  { %398 = vsyncpa [#allocation5], 1 }

</bundles_post_ra>
